<compile_context>
chip_gen: v6e
topology: v6e:2x2x1
jax: 0.10.0
libtpu: 0.0.40
codegen_flags: <defaults>
</compile_context>

<pallas_src>
import functools

import jax
import jax.numpy as jnp
import numpy as np
from jax import lax
from jax.experimental import pallas as pl
from jax.experimental.pallas import tpu as pltpu


def _round_up(x, k):
    return ((x + k - 1) // k) * k


def _center_loss_kernel(feat_ref, lab_ref, cent_hbm, out_ref, cent_vmem,
                        cent_sem, *, m_actual, tile_m, steps_per_chunk, c_blk,
                        num_c_blocks):
    k = pl.program_id(1)

    @pl.when(k == 0)
    def _init():
        # Zero this chunk's (8, D) partial accumulator and pull the bf16
        # (hi, lo) centers into a single VMEM scratch (one buffer, not two).
        out_ref[...] = jnp.zeros_like(out_ref)
        cp = pltpu.make_async_copy(cent_hbm, cent_vmem, cent_sem.at[0])
        cp.start()
        cp.wait()

    feat_dim = feat_ref.shape[-1]
    labels = lab_ref[...]                                    # (tile_m, 1) i32

    # ---- gather centers[labels] via a blocked one-hot matmul on the MXU ----
    base_ids = lax.broadcasted_iota(jnp.int32, (1, c_blk), 1)   # hoisted once

    def one_class_block(c_start, acc):
        onehot = (labels == (base_ids + c_start)).astype(jnp.bfloat16)
        hi = cent_vmem[0, pl.ds(c_start, c_blk), :]          # (c_blk, D) bf16
        lo = cent_vmem[1, pl.ds(c_start, c_blk), :]
        acc = acc + jnp.dot(onehot, hi, preferred_element_type=jnp.float32)
        acc = acc + jnp.dot(onehot, lo, preferred_element_type=jnp.float32)
        return acc

    zero_acc = jnp.zeros((tile_m, feat_dim), jnp.float32)
    if num_c_blocks == 1:
        centers_batch = one_class_block(0, zero_acc)
    else:
        # fori_loop (not a Python loop) bounds the live range of each
        # (tile_m, c_blk) one-hot block.
        centers_batch = lax.fori_loop(
            0, num_c_blocks,
            lambda cb, acc: one_class_block(
                pl.multiple_of(cb * c_blk, c_blk), acc),
            zero_acc)

    # ---- squared distance with ragged / phantom rows masked out ------------
    row0 = (pl.program_id(0) * steps_per_chunk + k) * tile_m
    row_idx = row0 + lax.broadcasted_iota(jnp.int32, (tile_m, 1), 0)
    valid = row_idx < m_actual                               # (tile_m, 1)

    # TODO(synk): gate the mask behind pl.when for interior tiles (minor win).
    f = feat_ref[...].astype(jnp.float32)
    diff = jnp.where(valid, f - centers_batch, 0.0)
    sq = diff * diff

    # Defer the cross-lane reduction: fold rows 8-at-a-time (pure element-wise
    # vreg adds) into the (8, D) accumulator that lives in the output block.
    partial = jnp.sum(sq.reshape(tile_m // 8, 8, feat_dim), axis=0)
    out_ref[...] += partial.reshape(out_ref.shape)


def center_loss(features, labels, centers, *, tile_m=None, num_parallel=2,
                class_block=1024):
    """mean_i ||features_i - centers[labels_i]||^2  (PyTorch CenterLoss.forward).

    features: (B, N, D) float; labels: (B, N) int; centers: (C, D) float.
    """
    B, N, D = features.shape
    C = centers.shape[0]
    m = B * N

    # Keep bf16/f16 features on the wire (upcast inside the kernel) so the
    # dominant, memory-bound stream is not doubled by a wrapper astype.
    if (jnp.issubdtype(features.dtype, jnp.floating)
            and np.dtype(features.dtype).itemsize <= 4):
        feats = features.reshape(m, D)
    else:
        feats = features.reshape(m, D).astype(jnp.float32)
    feat_bytes = np.dtype(feats.dtype).itemsize

    # TODO(synk): pack labels lane-dense ((m/128, 128)) to avoid the 128-lane
    # VMEM padding of the (tile_m, 1) block; it is accounted in the budget.
    labs = labels.reshape(m, 1).astype(jnp.int32)

    # Tiny-row edge case: a block must not be taller than the array.
    m_rows = m
    if m_rows < 8:
        pad = 8 - m_rows
        feats = jnp.pad(feats, ((0, pad), (0, 0)))
        labs = jnp.pad(labs, ((0, pad), (0, 0)))
        m_rows = 8

    # ---- class blocking + bf16 hi/lo split of the centers -------------------
    # TODO(synk): for C*D too large for a single VMEM-resident centers copy,
    # move the class blocking onto a grid axis instead of an in-kernel loop.
    c_blk = min(_round_up(class_block, 8), _round_up(C, 8))
    c_pad = _round_up(C, c_blk)
    num_c_blocks = c_pad // c_blk

    cent_f32 = centers.astype(jnp.float32)
    cent_hi = cent_f32.astype(jnp.bfloat16)
    cent_lo = (cent_f32 - cent_hi.astype(jnp.float32)).astype(jnp.bfloat16)
    cent_hilo = jnp.stack([cent_hi, cent_lo], axis=0)          # (2, C, D) bf16
    if c_pad != C:
        cent_hilo = jnp.pad(cent_hilo, ((0, 0), (0, c_pad - C), (0, 0)))

    # ---- VMEM budget / tile sizing ------------------------------------------
    phys = None
    try:
        info = pltpu.get_tpu_info()
        for name in ("vmem_capacity_bytes", "vmem_size_bytes", "vmem_bytes"):
            val = getattr(info, name, None)
            if val:
                phys = int(val)
                break
    except Exception:
        phys = None
    if not phys:
        phys = 64 * 1024 * 1024          # safe floor (v7x per-TensorCore VMEM)

    vmem_limit = max(32 << 20, min(phys - (8 << 20), 120 << 20))
    budget = max(24 << 20, min((phys * 3) // 4, 96 << 20))
    budget = min(budget, vmem_limit - (4 << 20))

    bytes_centers = 2 * c_pad * D * 2            # single bf16 hi/lo copy
    fixed_bytes = bytes_centers + (2 << 20)      # + accumulator / headroom
    per_row = (2 * feat_bytes * D                # double-buffered feature rows
               + 2 * 512                         # 128-lane padded labels (x2)
               + 6 * c_blk                       # one-hot + compare temporaries
               + 16 * D)                         # f32 gather/diff/square temps
    tile_cap = max(8, (budget - fixed_bytes) // per_row)

    req = tile_cap if tile_m is None else tile_m
    tile_m = max(8, min(req, tile_cap, (m_rows // 8) * 8, 32768))
    tile_m = (tile_m // 8) * 8

    total_steps = -(-m_rows // tile_m)
    # Always hand v7x's two TensorCores a chunk each (num_chunks need not
    # divide total_steps: phantom steps are clamped + masked).
    num_chunks = max(1, min(num_parallel, total_steps))
    steps_per_chunk = -(-total_steps // num_chunks)
    last_block = total_steps - 1

    kernel = functools.partial(
        _center_loss_kernel, m_actual=m, tile_m=tile_m,
        steps_per_chunk=steps_per_chunk, c_blk=c_blk,
        num_c_blocks=num_c_blocks)

    def row_map(p, k):
        # Clamp so phantom trailing steps re-fetch the last real block; the
        # in-kernel row mask zeroes their contribution.
        return (jnp.minimum(p * steps_per_chunk + k, last_block), 0)

    partials = pl.pallas_call(
        kernel,
        out_shape=jax.ShapeDtypeStruct((num_chunks, 8, D), jnp.float32),
        grid_spec=pltpu.PrefetchScalarGridSpec(
            num_scalar_prefetch=0,
            grid=(num_chunks, steps_per_chunk),
            in_specs=[
                pl.BlockSpec((tile_m, D), row_map),        # features tile
                pl.BlockSpec((tile_m, 1), row_map),        # labels tile
                pl.BlockSpec(memory_space=pl.ANY),         # centers stay in HBM
            ],
            out_specs=pl.BlockSpec((1, 8, D), lambda p, k: (p, 0, 0)),
            scratch_shapes=[
                pltpu.VMEM((2, c_pad, D), jnp.bfloat16),   # hi/lo centers
                pltpu.SemaphoreType.DMA((1,)),
            ],
        ),
        compiler_params=pltpu.CompilerParams(
            dimension_semantics=("parallel", "arbitrary"),
            vmem_limit_bytes=int(vmem_limit)),
    )(feats, labs, cent_hilo)

    return jnp.sum(partials) / jnp.float32(m)


def center_loss_reference(features, labels, centers):
    B, N, D = features.shape
    f = features.reshape(-1, D).astype(jnp.float32)
    l = labels.reshape(-1).astype(jnp.int32)
    cb = centers.astype(jnp.float32)[l]
    return jnp.mean(jnp.sum((f - cb) ** 2, axis=1))


if __name__ == "__main__":
    # Small shapes consistent with the module's forward: (B, N, D) features.
    B, N, D = 2, 8, 32
    num_classes = 10

    key = jax.random.PRNGKey(0)
    k_feat, k_lab, k_cent = jax.random.split(key, 3)

    features = jax.random.normal(k_feat, (B, N, D), dtype=jnp.float32)
    labels = jax.random.randint(k_lab, (B, N), 0, num_classes, dtype=jnp.int32)
    # Deterministic parameter init (stand-in for torch.randn in __init__).
    centers = jax.random.normal(k_cent, (num_classes, D), dtype=jnp.float32)

    ref = center_loss_reference(features, labels, centers)

    loss = jax.block_until_ready(center_loss(features, labels, centers))
    assert np.allclose(np.asarray(loss), np.asarray(ref), rtol=1e-4, atol=1e-5), \
        (np.asarray(loss), np.asarray(ref))

    # Also exercise the blocked-over-classes (fori_loop) gather path.
    loss_blk = jax.block_until_ready(
        center_loss(features, labels, centers, class_block=8))
    assert np.allclose(np.asarray(loss_blk), np.asarray(ref), rtol=1e-4,
                       atol=1e-5), (np.asarray(loss_blk), np.asarray(ref))

    print("KERNEL_OK")
</pallas_src>

<mosaic_0001>
module attributes {stable_mosaic.version = 11 : i64} {
  func.func @_center_loss_kernel(%arg0: i32, %arg1: i32, %arg2: memref<16x32xf32, #tpu.memory_space<vmem>>, %arg3: memref<16x1xi32, #tpu.memory_space<vmem>>, %arg4: memref<2x16x32xbf16, #tpu.memory_space<any>>, %arg5: memref<1x8x32xf32, #tpu.memory_space<vmem>>, %arg6: memref<2x16x32xbf16, #tpu.memory_space<vmem>>, %arg7: memref<1x!tpu.dma_semaphore, #tpu.memory_space<semaphore_mem>>) attributes {dimension_semantics = [#tpu.dimension_semantics<parallel>, #tpu.dimension_semantics<arbitrary>], iteration_bounds = array<i64: 1, 1>, scalar_prefetch = 0 : i64, scratch_operands = 2 : i64, tpu.core_type = #tpu.core_type<tc>, window_params = [{transform_indices = @transform_0, window_bounds = array<i64: 16, 32>}, {transform_indices = @transform_1, window_bounds = array<i64: 16, 1>}, {}, {transform_indices = @transform_3, window_bounds = array<i64: 1, 8, 32>}]} {
    %c0_i32 = arith.constant 0 : i32
    %0 = arith.cmpi eq, %arg1, %c0_i32 : i32
    %1 = arith.extui %0 : i1 to i32
    %c0_i32_0 = arith.constant 0 : i32
    %2 = arith.cmpi ne, %1, %c0_i32_0 : i32
    scf.if %2 {
      %cst_21 = arith.constant 0.000000e+00 : f32
      %43 = vector.broadcast %cst_21 : f32 to vector<1x8x32xf32>
      %c0_22 = arith.constant 0 : index
      %c0_23 = arith.constant 0 : index
      %c0_24 = arith.constant 0 : index
      %44 = vector.load %arg5[%c0_22, %c0_23, %c0_24] : memref<1x8x32xf32, #tpu.memory_space<vmem>>, vector<1x8x32xf32>
      tpu.vector_store %arg5[%c0_22, %c0_23, %c0_24], %43 {strides = array<i32>} : memref<1x8x32xf32, #tpu.memory_space<vmem>>, vector<1x8x32xf32>,
      %c0_i32_25 = arith.constant 0 : i32
      %45 = tpu.memref_slice %arg7[%c0_i32_25] : memref<1x!tpu.dma_semaphore, #tpu.memory_space<semaphore_mem>> -> memref<1x!tpu.dma_semaphore, #tpu.memory_space<semaphore_mem>>
      %46 = tpu.memref_squeeze %45 : memref<1x!tpu.dma_semaphore, #tpu.memory_space<semaphore_mem>> -> memref<!tpu.dma_semaphore, #tpu.memory_space<semaphore_mem>>
      tpu.enqueue_dma source(%arg4 : memref<2x16x32xbf16, #tpu.memory_space<any>>) target(%arg6 : memref<2x16x32xbf16, #tpu.memory_space<vmem>>) target_semaphore(%46 : memref<!tpu.dma_semaphore, #tpu.memory_space<semaphore_mem>>)
      %c0_i32_26 = arith.constant 0 : i32
      %47 = tpu.memref_slice %arg7[%c0_i32_26] : memref<1x!tpu.dma_semaphore, #tpu.memory_space<semaphore_mem>> -> memref<1x!tpu.dma_semaphore, #tpu.memory_space<semaphore_mem>>
      %48 = tpu.memref_squeeze %47 : memref<1x!tpu.dma_semaphore, #tpu.memory_space<semaphore_mem>> -> memref<!tpu.dma_semaphore, #tpu.memory_space<semaphore_mem>>
      tpu.wait_dma2 semaphore(%48 : memref<!tpu.dma_semaphore, #tpu.memory_space<semaphore_mem>>) src(%arg4 : memref<2x16x32xbf16, #tpu.memory_space<any>>) dst(%arg6 : memref<2x16x32xbf16, #tpu.memory_space<vmem>>)
    } else {
    }
    %c0 = arith.constant 0 : index
    %c0_1 = arith.constant 0 : index
    %3 = vector.load %arg3[%c0, %c0_1] : memref<16x1xi32, #tpu.memory_space<vmem>>, vector<16x1xi32>
    %4 = tpu.iota {dimensions = array<i32: 1>} : vector<1x16xi32>
    %cst = arith.constant 0.000000e+00 : f32
    %5 = vector.broadcast %cst : f32 to vector<16x32xf32>
    %c0_i32_2 = arith.constant 0 : i32
    %6 = vector.broadcast %c0_i32_2 : i32 to vector<1x16xi32>
    %7 = arith.addi %4, %6 : vector<1x16xi32>
    %8 = vector.broadcast %3 : vector<16x1xi32> to vector<16x16xi32>
    %9 = vector.broadcast %7 : vector<1x16xi32> to vector<16x16xi32>
    %10 = arith.cmpi eq, %8, %9 : vector<16x16xi32>
    %11 = arith.extui %10 : vector<16x16xi1> to vector<16x16xi32>
    %12 = arith.sitofp %11 : vector<16x16xi32> to vector<16x16xf32>
    %13 = arith.truncf %12 : vector<16x16xf32> to vector<16x16xbf16>
    %c0_3 = arith.constant 0 : index
    %c0_4 = arith.constant 0 : index
    %c0_5 = arith.constant 0 : index
    %14 = vector.load %arg6[%c0_3, %c0_4, %c0_5] : memref<2x16x32xbf16, #tpu.memory_space<vmem>>, vector<1x16x32xbf16>
    %15 = vector.shape_cast %14 : vector<1x16x32xbf16> to vector<16x32xbf16>
    %c1 = arith.constant 1 : index
    %c0_6 = arith.constant 0 : index
    %c0_7 = arith.constant 0 : index
    %16 = vector.load %arg6[%c1, %c0_6, %c0_7] : memref<2x16x32xbf16, #tpu.memory_space<vmem>>, vector<1x16x32xbf16>
    %17 = vector.shape_cast %16 : vector<1x16x32xbf16> to vector<16x32xbf16>
    %cst_8 = arith.constant dense<0.000000e+00> : vector<16x32xf32>
    %18 = tpu.matmul %13, %15, %cst_8 {dimension_numbers = #tpu.dot_dimension_numbers<[1], [0], [0], [1], [0, 0, 1, 1], [], []>} : vector<16x16xbf16>, vector<16x32xbf16>, vector<16x32xf32> -> vector<16x32xf32>
    %19 = arith.addf %5, %18 : vector<16x32xf32>
    %cst_9 = arith.constant dense<0.000000e+00> : vector<16x32xf32>
    %20 = tpu.matmul %13, %17, %cst_9 {dimension_numbers = #tpu.dot_dimension_numbers<[1], [0], [0], [1], [0, 0, 1, 1], [], []>} : vector<16x16xbf16>, vector<16x32xbf16>, vector<16x32xf32> -> vector<16x32xf32>
    %21 = arith.addf %19, %20 : vector<16x32xf32>
    %c1_i32 = arith.constant 1 : i32
    %22 = arith.muli %arg0, %c1_i32 : i32
    %23 = arith.addi %22, %arg1 : i32
    %c16_i32 = arith.constant 16 : i32
    %24 = arith.muli %23, %c16_i32 : i32
    %25 = tpu.iota {dimensions = array<i32: 0>} : vector<16x1xi32>
    %26 = vector.broadcast %24 : i32 to vector<16x1xi32>
    %27 = arith.addi %26, %25 : vector<16x1xi32>
    %c16_i32_10 = arith.constant 16 : i32
    %28 = vector.broadcast %c16_i32_10 : i32 to vector<16x1xi32>
    %29 = arith.cmpi slt, %27, %28 : vector<16x1xi32>
    %c0_11 = arith.constant 0 : index
    %c0_12 = arith.constant 0 : index
    %30 = vector.load %arg2[%c0_11, %c0_12] : memref<16x32xf32, #tpu.memory_space<vmem>>, vector<16x32xf32>
    %31 = arith.subf %30, %21 : vector<16x32xf32>
    %cst_13 = arith.constant 0.000000e+00 : f32
    %32 = vector.shape_cast %29 : vector<16x1xi1> to vector<16x1xi1>
    %33 = vector.broadcast %32 : vector<16x1xi1> to vector<16x32xi1>
    %34 = vector.broadcast %cst_13 : f32 to vector<16x32xf32>
    %35 = arith.select %33, %31, %34 : vector<16x32xi1>, vector<16x32xf32>
    %36 = arith.mulf %35, %35 : vector<16x32xf32>
    %37 = vector.shape_cast %36 : vector<16x32xf32> to vector<2x8x32xf32>
    %cst_14 = arith.constant dense<0.000000e+00> : vector<8x32xf32>
    %38 = vector.multi_reduction <add>, %37, %cst_14 [0] : vector<2x8x32xf32> to vector<8x32xf32>
    %c0_15 = arith.constant 0 : index
    %c0_16 = arith.constant 0 : index
    %c0_17 = arith.constant 0 : index
    %39 = vector.load %arg5[%c0_15, %c0_16, %c0_17] : memref<1x8x32xf32, #tpu.memory_space<vmem>>, vector<1x8x32xf32>
    %40 = vector.shape_cast %38 : vector<8x32xf32> to vector<1x8x32xf32>
    %41 = arith.addf %39, %40 : vector<1x8x32xf32>
    %c0_18 = arith.constant 0 : index
    %c0_19 = arith.constant 0 : index
    %c0_20 = arith.constant 0 : index
    %42 = vector.load %arg5[%c0_18, %c0_19, %c0_20] : memref<1x8x32xf32, #tpu.memory_space<vmem>>, vector<1x8x32xf32>
    tpu.vector_store %arg5[%c0_18, %c0_19, %c0_20], %41 {strides = array<i32>} : memref<1x8x32xf32, #tpu.memory_space<vmem>>, vector<1x8x32xf32>,
    return
  }
  func.func @transform_0(%arg0: i32, %arg1: i32) -> (i32, i32) {
    %c1_i32 = arith.constant 1 : i32
    %0 = arith.muli %arg0, %c1_i32 : i32
    %1 = arith.addi %0, %arg1 : i32
    %c0_i32 = arith.constant 0 : i32
    %2 = arith.minsi %1, %c0_i32 : i32
    %c0_i32_0 = arith.constant 0 : i32
    %c0_i32_1 = arith.constant 0 : i32
    return %2, %c0_i32_0 : i32, i32
  }
  func.func @transform_1(%arg0: i32, %arg1: i32) -> (i32, i32) {
    %c1_i32 = arith.constant 1 : i32
    %0 = arith.muli %arg0, %c1_i32 : i32
    %1 = arith.addi %0, %arg1 : i32
    %c0_i32 = arith.constant 0 : i32
    %2 = arith.minsi %1, %c0_i32 : i32
    %c0_i32_0 = arith.constant 0 : i32
    %c0_i32_1 = arith.constant 0 : i32
    return %2, %c0_i32_0 : i32, i32
  }
  func.func @transform_3(%arg0: i32, %arg1: i32) -> (i32, i32, i32) {
    %c0_i32 = arith.constant 0 : i32
    %c0_i32_0 = arith.constant 0 : i32
    %c0_i32_1 = arith.constant 0 : i32
    return %arg0, %c0_i32, %c0_i32_0 : i32, i32, i32
  }
}

</mosaic_0001>

<bundles_post_ra>
// kernel: tpu_custom_call.1
= control target key start
LH: loop header
LB: loop body
LE: loop exit
PB: predicated region body
PF: predicated region fallthrough
CT: control target
= control target key end

     0   :  { %8 = vsyncpa [#allocation5], 0  ;;  %vm82_vm0 = vcmask 261120   ;;  %v356_v0 = vmov 0.0   ;;  %s357_s12 = smov [#allocation2]   ;;  %s403_s0 = inlined_call_operand.vmem [shape: f32[16,32], index: 0, kind: input, shape index: {}]   ;;  %s404_s1 = inlined_call_operand.vmem [shape: s32[16,1], index: 1, kind: input, shape index: {}]   ;;  %s405_s2 = inlined_call_operand.hbm [shape: bf16[2,16,32], index: 2, kind: input, shape index: {}]   ;;  %s406_s3 = inlined_call_operand.hbm [shape: f32[1,8,32], index: 3, kind: output, shape index: {}]  }
   0x1   :  { %83 = vst.msk [vmem:[#allocation4] sm:$0xff] %vm82_vm0, %v356_v0  ;;  %s91_s13 = sshll.u32 %s357_s12, 4  ;;  %s92_s13 = int_to_ptr.vmem [resolvable:$true] %s91_s13 }
   0x2   :  { %s320_s14 = scalar_lea.vmem %s92_s13, 256  ;;  %p325_p1 = scmp.lt.s32.totalorder %s92_s13, %s92_s13 }
   0x3   :  { %p321_p0 = scmp.ne.s32.totalorder %s92_s13, %s320_s14  ;;  %p326_p2 = scmp.lt.s32.totalorder %s320_s14, %s320_s14 }
   0x5   :  { %p327_p3 = por %p326_p2, %p325_p1 }
   0x7   :  { %p328_p4 = pnand %p327_p3, %p321_p0 }
   0x9   :  { %331 = shalt.err (!%p328_p4)  }
   0xa   :  { %94 = dma.hbm_to_vmem [thread:$0]  %s405_s2, 256, %s92_s13, [#allocation3] }
   0xb   :  { %352 = dma.done.wait [#allocation3], 256 }
   0xc   :  { %353 = vsyncadd [#allocation3], 4294967040  ;;  %292 = vmatprep.subr.bf16.mxu0 %v356_v0  ;;  %298 = vmatprep.subr.bf16.mxu1 %v356_v0  ;;  %v358_v1 = vmov 0   ;;  %v100_v2 = vld [vmem:[%s404_s1] sm:$0xff]  ;;  %v310_v3 = vld [vmem:[#allocation2 + $0x8] sm:$0xff]   ;;  %vm359_vm1 = vmmov 0   ;;  %v102_v6 = vlaneseq }
   0xd   :  { %309 = vset.pattern.permute.xlu0 %v358_v1  ;;  %v101_v4 = vld [vmem:[%s404_s1 + $0x8] sm:$0xff]  ;;  %v311_v5 = vld [vmem:[#allocation2] sm:$0xff]   ;;  %293 = vmatpush3.bf16.msra.mxu0 %v310_v3  ;;  %vm128_vm4 = vcmask 130048   ;;  %v246_v31 = vld [vmem:[#allocation4] sm:$0xff]  ;;  %s360_s23 = smov [#allocation4]  }
   0xe   :  { %105 = vperm.xlu0 %309, %v100_v2   ;;  %299 = vmatpush3.bf16.msra.mxu1 %v311_v5  ;;  %v103_v7 = vand.u32 127, %v102_v6  ;;  %v230_v15 = vld [vmem:[%s403_s0] sm:$0xff]  ;;  %v231_v22 = vld [vmem:[%s403_s0 + $0x8] sm:$0xff]  ;;  %s255_s24 = sshll.u32 %s360_s23, 4  ;;  %s256_s24 = int_to_ptr.vmem [resolvable:$true] %s255_s24 }
   0xf   :  { %294 = vmatprep.mubr.msk.bf16.mxu0 %vm359_vm1, %v356_v0  ;;  %300 = vmatprep.mubr.msk.bf16.mxu1 %vm359_vm1, %v356_v0  ;;  %s332_s25 = scalar_lea.vmem %s256_s24, 128  ;;  %p337_p6 = scmp.lt.s32.totalorder %s256_s24, %s256_s24 }
  0x10   :  { %p333_p5 = scmp.ne.s32.totalorder %s256_s24, %s332_s25  ;;  %p338_p7 = scmp.lt.s32.totalorder %s332_s25, %s332_s25 }
  0x12   :  { %108 = vperm.xlu0 %309, %v101_v4   ;;  %p339_p8 = por %p338_p7, %p337_p6 }
  0x14   :  { %p340_p9 = pnand %p339_p8, %p333_p5 }
  0x89   :  { %v106_v8 = vpop.permute.xlu0 %105 }
  0x8a   :  { %vm110_vm2 = vcmp.eq.s32.totalorder %v106_v8, %v103_v7 }
  0x8b   :  { %v281_v10 = vsel %vm110_vm2, 1.0, %v356_v0 }
  0x8d   :  { %v109_v9 = vpop.permute.xlu0 %108 }
  0x8e   :  { %vm111_vm3 = vcmp.eq.s32.totalorder %v109_v9, %v103_v7 }
  0x8f   :  { %v282_v11 = vsel %vm111_vm3, 1.0, %v356_v0 }
  0x90   :  { %v116_v12 = vpack.c.bf16 %v282_v11, %v281_v10 }
  0x92   :  { %295 = vmatmul.mubr.msk.bf16.vlgmr.msra.gmra.mxu0 %vm128_vm4, %v116_v12  ;;  %301 = vmatmul.mubr.msk.bf16.vlgmr.msra.gmra.mxu1 %vm128_vm4, %v116_v12 }
 0x152   :  { %v166_v13 = vpop.f32.mrf.mxu0  ;;  %v213_v14 = vpop.f32.mrf.mxu1 }
 0x153   :  { %v214_v16 = vadd.f32 %v213_v14, %v166_v13 }
 0x154   :  { %v296_v17 = vpop.f32.mrf.mxu0  ;;  %v302_v18 = vpop.f32.mrf.mxu1 }
 0x155   :  { %v232_v19 = vsub.f32 %v230_v15, %v214_v16 }
 0x156   :  { %v169_v20 = vpop.f32.mrf.mxu0  ;;  %v216_v21 = vpop.f32.mrf.mxu1 }
 0x157   :  { %v217_v23 = vadd.f32 %v216_v21, %v169_v20  ;;  %v240_v26 = vmul.f32 %v232_v19, %v232_v19 }
 0x158   :  { %v297_v24 = vpop.f32.mrf.mxu0  ;;  %v303_v25 = vpop.f32.mrf.mxu1 }
 0x159   :  { %v233_v27 = vsub.f32 %v231_v22, %v217_v23  ;;  %v243_v29 = vsel %vm82_vm0, %v240_v26, 0.0 }
 0x15b   :  { %v241_v28 = vmul.f32 %v233_v27, %v233_v27 }
 0x15d   :  { %v244_v30 = vsel %vm82_vm0, %v241_v28, 0.0 }
 0x15e   :  { %v245_v32 = vadd.f32 %v244_v30, %v243_v29 }
 0x160   :  { %v247_v33 = vadd.f32 %v246_v31, %v245_v32 }
 0x162   :  { %248 = vst.msk [vmem:[#allocation4] sm:$0xff] %vm82_vm0, %v247_v33 }
 0x163   :  { %343 = shalt.err (!%p340_p9)
}
 0x164   :  { %258 = dma.vmem_to_hbm [thread:$0]  %s256_s24, 128, %s406_s3, [#allocation5]  }
 0x165   :  { %354 = dma.done.wait [#allocation5], 128  }
 0x166   :  { %355 = vsyncadd [#allocation5], 4294967168 }
 0x167   :  { %262 = vsyncpa [#allocation5], 1 }
 0x168   :  { %263 = vsyncmov [#allocation3] }
 0x16b   :  { %s264_s27 = vpop.sfrf %263 }
 0x16c   :  { %p287_p10 = scmp.ne.s32.totalorder %s264_s27, 0 }
 0x16e   :  { %268 = shalt.err (%p287_p10)  }

</bundles_post_ra>
